<compile_context>
chip_gen: v5e
topology: v5e:2x2
jax: 0.10.0
libtpu: 0.0.40
codegen_flags: <defaults>
</compile_context>

<pallas_src>
import functools
import math

import jax
import jax.numpy as jnp
from jax.experimental import pallas as pl
from jax.experimental.pallas import tpu as pltpu


# ---------------------------------------------------------------------------
# Kernel
# ---------------------------------------------------------------------------
def _fused_downsample_kernel(x_ref, w_ref, b_ref, o_ref, *, kh, kw, h_out, w_out):
    # x_ref: (TB, Hp2, Wp2, 4*C_in)   space-to-depth'd, zero-padded input
    # w_ref: (kh*kw, 4*C_in, C_out)   per-tap matmul weights
    # b_ref: (1, C_out)
    # o_ref: (TB, h_out, w_out, C_out)
    tb = o_ref.shape[0]
    c4 = x_ref.shape[-1]
    c_out = o_ref.shape[-1]
    n = tb * h_out * w_out

    x = x_ref[...]
    acc = jnp.zeros((n, c_out), dtype=jnp.float32)
    # kh*kw is tiny (2x2 for kernel_size=3) -> unrolled python loop of MXU matmuls.
    for dy in range(kh):
        for dx in range(kw):
            patch = x[:, dy:dy + h_out, dx:dx + w_out, :]
            acc = acc + jnp.dot(
                patch.reshape(n, c4),
                w_ref[dy * kw + dx],
                preferred_element_type=jnp.float32,
            )
    acc = acc + b_ref[...].astype(jnp.float32)
    o_ref[...] = acc.reshape(tb, h_out, w_out, c_out).astype(o_ref.dtype)


# ---------------------------------------------------------------------------
# Helpers
# ---------------------------------------------------------------------------
def _effective_weight(weight, multiplier):
    """FusedDownsample's blur-fused weight: pad by 1, average 4 shifted copies."""
    w = weight * jnp.asarray(multiplier, weight.dtype)
    w = jnp.pad(w, ((0, 0), (0, 0), (1, 1), (1, 1)))
    w = (w[:, :, 1:, 1:] + w[:, :, :-1, 1:] + w[:, :, 1:, :-1] + w[:, :, :-1, :-1]) * 0.25
    return w  # (C_out, C_in, k+1, k+1)


def _vmem_limit_bytes():
    """Scoped-VMEM limit suited to the local chip (v5e/v6e: 128 MiB, v7x: 64 MiB)."""
    cap = None
    try:
        cap = getattr(pltpu.get_tpu_info(), "vmem_capacity_bytes", None)
    except Exception:
        cap = None
    if not cap:
        cap = 64 * 1024 * 1024
    return int(min(cap // 2, 64 * 1024 * 1024))


def _pick_tile_b(b, plane_pair_bytes, budget_bytes):
    """Largest divisor of b whose double-buffered in+out blocks fit the budget,
    preferring to keep >=2 grid steps (megacore / 2 TensorCores)."""
    divisors = [d for d in range(1, b + 1) if b % d == 0]
    fitting = [d for d in divisors if 2 * d * plane_pair_bytes <= budget_bytes] or [1]
    multi_step = [d for d in fitting if b // d >= 2]
    return max(multi_step) if multi_step else max(fitting)


# ---------------------------------------------------------------------------
# Wrapper
# ---------------------------------------------------------------------------
def fused_downsample(x, weight, bias, *, padding=0, multiplier=None):
    """Pallas equivalent of FusedDownsample.forward. x: (B, C_in, H, W) NCHW."""
    assert x.ndim == 4, "FusedDownsample operates on 4D NCHW inputs"
    b, c_in, h, w = x.shape
    c_out, c_in_w, ks, ks2 = weight.shape
    assert ks == ks2 and c_in_w == c_in
    if multiplier is None:
        multiplier = math.sqrt(2.0 / (c_in * ks * ks))
    pad = int(padding)

    # -- effective (blur-fused) weight, K = kernel_size + 1
    w_eff = _effective_weight(weight, multiplier)        # (C_out, C_in, K, K)
    K = ks + 1
    kh = (K + 1) // 2                                    # tap extent after space-to-depth

    h_p, w_p = h + 2 * pad, w + 2 * pad
    h_out = (h_p - K) // 2 + 1
    w_out = (w_p - K) // 2 + 1
    assert h_out >= 1 and w_out >= 1, "input too small for this kernel/padding"
    hp2 = h_out + kh - 1
    wp2 = w_out + kh - 1
    c4 = 4 * c_in

    # -- layout plumbing (plain XLA): pad, space-to-depth, channel-last
    pad_hi_h = 2 * hp2 - h - pad   # may be negative (crop an unused row)
    pad_hi_w = 2 * wp2 - w - pad
    zero = jnp.asarray(0, x.dtype)
    x_p = jax.lax.pad(
        x, zero, ((0, 0, 0), (0, 0, 0), (pad, pad_hi_h, 0), (pad, pad_hi_w, 0)))
    x_s2d = x_p.reshape(b, c_in, hp2, 2, wp2, 2)
    x_s2d = jnp.transpose(x_s2d, (0, 2, 4, 3, 5, 1))     # (B, h2, w2, py, px, C_in)
    x_s2d = x_s2d.reshape(b, hp2, wp2, c4)

    # -- weights: (C_out, C_in, K, K) -> per-tap (kh*kh, 4*C_in, C_out), same channel order
    w_hwio = jnp.transpose(w_eff, (2, 3, 1, 0))          # (K, K, C_in, C_out)
    w_hwio = jnp.pad(w_hwio, ((0, 2 * kh - K), (0, 2 * kh - K), (0, 0), (0, 0)))
    w_taps = w_hwio.reshape(kh, 2, kh, 2, c_in, c_out)
    w_taps = jnp.transpose(w_taps, (0, 2, 1, 3, 4, 5))   # (dy, dx, py, px, C_in, C_out)
    w_taps = w_taps.reshape(kh * kh, c4, c_out).astype(x.dtype)

    bias2d = bias.reshape(1, c_out).astype(x.dtype)

    # -- tiling: how many images per grid step, sized to the chip's VMEM
    itemsize = jnp.dtype(x.dtype).itemsize
    plane_pair = (hp2 * wp2 * c4 + h_out * w_out * c_out) * itemsize
    vmem_limit = _vmem_limit_bytes()
    tile_b = _pick_tile_b(b, plane_pair, int(0.7 * vmem_limit))
    grid = (b // tile_b,)

    kernel = functools.partial(
        _fused_downsample_kernel, kh=kh, kw=kh, h_out=h_out, w_out=w_out)

    out_nhwc = pl.pallas_call(
        kernel,
        out_shape=jax.ShapeDtypeStruct((b, h_out, w_out, c_out), x.dtype),
        grid=grid,
        in_specs=[
            pl.BlockSpec((tile_b, hp2, wp2, c4), lambda i: (i, 0, 0, 0)),
            pl.BlockSpec((kh * kh, c4, c_out), lambda i: (0, 0, 0)),
            pl.BlockSpec((1, c_out), lambda i: (0, 0)),
        ],
        out_specs=pl.BlockSpec((tile_b, h_out, w_out, c_out), lambda i: (i, 0, 0, 0)),
        compiler_params=pltpu.CompilerParams(
            dimension_semantics=("parallel",),
            vmem_limit_bytes=vmem_limit,
        ),
    )(x_s2d, w_taps, bias2d)

    return jnp.transpose(out_nhwc, (0, 3, 1, 2))         # back to NCHW


# ---------------------------------------------------------------------------
# Reference + test
# ---------------------------------------------------------------------------
def _reference_fused_downsample(x, weight, bias, multiplier, padding):
    w = _effective_weight(weight, multiplier)
    out = jax.lax.conv_general_dilated(
        x, w, window_strides=(2, 2),
        padding=[(padding, padding), (padding, padding)],
        dimension_numbers=("NCHW", "OIHW", "NCHW"),
        precision=jax.lax.Precision.HIGHEST,
    )
    return out + bias.reshape(1, -1, 1, 1)


if __name__ == "__main__":
    key = jax.random.PRNGKey(0)
    k_x, k_w = jax.random.split(key)

    in_channel, out_channel, kernel_size, padding = 4, 8, 3, 1
    x = jax.random.normal(k_x, (2, in_channel, 16, 16), dtype=jnp.float32)
    weight = jax.random.normal(
        k_w, (out_channel, in_channel, kernel_size, kernel_size), dtype=jnp.float32)
    bias = jnp.zeros((out_channel,), dtype=jnp.float32)
    multiplier = math.sqrt(2.0 / (in_channel * kernel_size * kernel_size))

    out = fused_downsample(x, weight, bias, padding=padding, multiplier=multiplier)
    out = jax.block_until_ready(out)

    ref = _reference_fused_downsample(x, weight, bias, multiplier, padding)
    assert out.shape == (2, out_channel, 8, 8), out.shape
    max_err = float(jnp.max(jnp.abs(out - ref)))
    assert jnp.allclose(out, ref, atol=1e-2, rtol=1e-2), f"mismatch vs reference: {max_err}"

    print("KERNEL_OK")
</pallas_src>

<mosaic_0001>
module attributes {stable_mosaic.version = 11 : i64} {
  func.func @_fused_downsample_kernel(%arg0: i32, %arg1: memref<1x9x9x16xf32, #tpu.memory_space<vmem>>, %arg2: memref<4x16x8xf32, #tpu.memory_space<vmem>>, %arg3: memref<1x8xf32, #tpu.memory_space<vmem>>, %arg4: memref<1x8x8x8xf32, #tpu.memory_space<vmem>>) attributes {dimension_semantics = [#tpu.dimension_semantics<parallel>], iteration_bounds = array<i64: 2>, scalar_prefetch = 0 : i64, scratch_operands = 0 : i64, tpu.core_type = #tpu.core_type<tc>, window_params = [{transform_indices = @transform_0, window_bounds = array<i64: 1, 9, 9, 16>}, {pipeline_mode = #tpu.pipeline_mode<synchronous>, transform_indices = @transform_1, window_bounds = array<i64: 4, 16, 8>}, {pipeline_mode = #tpu.pipeline_mode<synchronous>, transform_indices = @transform_2, window_bounds = array<i64: 1, 8>}, {transform_indices = @transform_3, window_bounds = array<i64: 1, 8, 8, 8>}]} {
    %c0 = arith.constant 0 : index
    %c0_0 = arith.constant 0 : index
    %c0_1 = arith.constant 0 : index
    %c0_2 = arith.constant 0 : index
    %0 = vector.load %arg1[%c0, %c0_0, %c0_1, %c0_2] : memref<1x9x9x16xf32, #tpu.memory_space<vmem>>, vector<1x9x9x16xf32>
    %cst = arith.constant 0.000000e+00 : f32
    %1 = vector.broadcast %cst : f32 to vector<64x8xf32>
    %2 = vector.extract_strided_slice %0 {offsets = [0, 0, 0, 0], sizes = [1, 8, 8, 16], strides = [1, 1, 1, 1]} : vector<1x9x9x16xf32> to vector<1x8x8x16xf32>
    %3 = vector.shape_cast %2 : vector<1x8x8x16xf32> to vector<64x16xf32>
    %c0_3 = arith.constant 0 : index
    %c0_4 = arith.constant 0 : index
    %c0_5 = arith.constant 0 : index
    %4 = vector.load %arg2[%c0_3, %c0_4, %c0_5] : memref<4x16x8xf32, #tpu.memory_space<vmem>>, vector<1x16x8xf32>
    %5 = vector.shape_cast %4 : vector<1x16x8xf32> to vector<16x8xf32>
    %cst_6 = arith.constant dense<0.000000e+00> : vector<64x8xf32>
    %6 = tpu.matmul %3, %5, %cst_6 {dimension_numbers = #tpu.dot_dimension_numbers<[1], [0], [0], [1], [0, 0, 1, 1], [], []>} : vector<64x16xf32>, vector<16x8xf32>, vector<64x8xf32> -> vector<64x8xf32>
    %7 = arith.addf %1, %6 : vector<64x8xf32>
    %8 = vector.extract_strided_slice %0 {offsets = [0, 0, 1, 0], sizes = [1, 8, 8, 16], strides = [1, 1, 1, 1]} : vector<1x9x9x16xf32> to vector<1x8x8x16xf32>
    %9 = vector.shape_cast %8 : vector<1x8x8x16xf32> to vector<64x16xf32>
    %c1 = arith.constant 1 : index
    %c0_7 = arith.constant 0 : index
    %c0_8 = arith.constant 0 : index
    %10 = vector.load %arg2[%c1, %c0_7, %c0_8] : memref<4x16x8xf32, #tpu.memory_space<vmem>>, vector<1x16x8xf32>
    %11 = vector.shape_cast %10 : vector<1x16x8xf32> to vector<16x8xf32>
    %cst_9 = arith.constant dense<0.000000e+00> : vector<64x8xf32>
    %12 = tpu.matmul %9, %11, %cst_9 {dimension_numbers = #tpu.dot_dimension_numbers<[1], [0], [0], [1], [0, 0, 1, 1], [], []>} : vector<64x16xf32>, vector<16x8xf32>, vector<64x8xf32> -> vector<64x8xf32>
    %13 = arith.addf %7, %12 : vector<64x8xf32>
    %14 = vector.extract_strided_slice %0 {offsets = [0, 1, 0, 0], sizes = [1, 8, 8, 16], strides = [1, 1, 1, 1]} : vector<1x9x9x16xf32> to vector<1x8x8x16xf32>
    %15 = vector.shape_cast %14 : vector<1x8x8x16xf32> to vector<64x16xf32>
    %c2 = arith.constant 2 : index
    %c0_10 = arith.constant 0 : index
    %c0_11 = arith.constant 0 : index
    %16 = vector.load %arg2[%c2, %c0_10, %c0_11] : memref<4x16x8xf32, #tpu.memory_space<vmem>>, vector<1x16x8xf32>
    %17 = vector.shape_cast %16 : vector<1x16x8xf32> to vector<16x8xf32>
    %cst_12 = arith.constant dense<0.000000e+00> : vector<64x8xf32>
    %18 = tpu.matmul %15, %17, %cst_12 {dimension_numbers = #tpu.dot_dimension_numbers<[1], [0], [0], [1], [0, 0, 1, 1], [], []>} : vector<64x16xf32>, vector<16x8xf32>, vector<64x8xf32> -> vector<64x8xf32>
    %19 = arith.addf %13, %18 : vector<64x8xf32>
    %20 = vector.extract_strided_slice %0 {offsets = [0, 1, 1, 0], sizes = [1, 8, 8, 16], strides = [1, 1, 1, 1]} : vector<1x9x9x16xf32> to vector<1x8x8x16xf32>
    %21 = vector.shape_cast %20 : vector<1x8x8x16xf32> to vector<64x16xf32>
    %c3 = arith.constant 3 : index
    %c0_13 = arith.constant 0 : index
    %c0_14 = arith.constant 0 : index
    %22 = vector.load %arg2[%c3, %c0_13, %c0_14] : memref<4x16x8xf32, #tpu.memory_space<vmem>>, vector<1x16x8xf32>
    %23 = vector.shape_cast %22 : vector<1x16x8xf32> to vector<16x8xf32>
    %cst_15 = arith.constant dense<0.000000e+00> : vector<64x8xf32>
    %24 = tpu.matmul %21, %23, %cst_15 {dimension_numbers = #tpu.dot_dimension_numbers<[1], [0], [0], [1], [0, 0, 1, 1], [], []>} : vector<64x16xf32>, vector<16x8xf32>, vector<64x8xf32> -> vector<64x8xf32>
    %25 = arith.addf %19, %24 : vector<64x8xf32>
    %c0_16 = arith.constant 0 : index
    %c0_17 = arith.constant 0 : index
    %26 = vector.load %arg3[%c0_16, %c0_17] : memref<1x8xf32, #tpu.memory_space<vmem>>, vector<1x8xf32>
    %27 = vector.broadcast %26 : vector<1x8xf32> to vector<64x8xf32>
    %28 = arith.addf %25, %27 : vector<64x8xf32>
    %29 = vector.shape_cast %28 : vector<64x8xf32> to vector<1x8x8x8xf32>
    %c0_18 = arith.constant 0 : index
    %c0_19 = arith.constant 0 : index
    %c0_20 = arith.constant 0 : index
    %c0_21 = arith.constant 0 : index
    %30 = vector.load %arg4[%c0_18, %c0_19, %c0_20, %c0_21] : memref<1x8x8x8xf32, #tpu.memory_space<vmem>>, vector<1x8x8x8xf32>
    tpu.vector_store %arg4[%c0_18, %c0_19, %c0_20, %c0_21], %29 {strides = array<i32>} : memref<1x8x8x8xf32, #tpu.memory_space<vmem>>, vector<1x8x8x8xf32>,
    return
  }
  func.func @transform_0(%arg0: i32) -> (i32, i32, i32, i32) {
    %c0_i32 = arith.constant 0 : i32
    %c0_i32_0 = arith.constant 0 : i32
    %c0_i32_1 = arith.constant 0 : i32
    %c0_i32_2 = arith.constant 0 : i32
    return %arg0, %c0_i32, %c0_i32_0, %c0_i32_1 : i32, i32, i32, i32
  }
  func.func @transform_1(%arg0: i32) -> (i32, i32, i32) {
    %c0_i32 = arith.constant 0 : i32
    %c0_i32_0 = arith.constant 0 : i32
    %c0_i32_1 = arith.constant 0 : i32
    %c0_i32_2 = arith.constant 0 : i32
    return %c0_i32, %c0_i32_0, %c0_i32_1 : i32, i32, i32
  }
  func.func @transform_2(%arg0: i32) -> (i32, i32) {
    %c0_i32 = arith.constant 0 : i32
    %c0_i32_0 = arith.constant 0 : i32
    %c0_i32_1 = arith.constant 0 : i32
    return %c0_i32, %c0_i32_0 : i32, i32
  }
  func.func @transform_3(%arg0: i32) -> (i32, i32, i32, i32) {
    %c0_i32 = arith.constant 0 : i32
    %c0_i32_0 = arith.constant 0 : i32
    %c0_i32_1 = arith.constant 0 : i32
    %c0_i32_2 = arith.constant 0 : i32
    return %arg0, %c0_i32, %c0_i32_0, %c0_i32_1 : i32, i32, i32, i32
  }
}

</mosaic_0001>

<bundles_post_ra>
// kernel: tpu_custom_call.1
= control target key start
LH: loop header
LB: loop body
LE: loop exit
PB: predicated region body
PF: predicated region fallthrough
CT: control target
= control target key end

     0   :  { %8 = vsyncpa [#allocation3], 0  ;;  %s945_s0 = inlined_call_operand.vmem [shape: f32[2,9,9,16], index: 0, kind: input, shape index: {}]   ;;  %s946_s1 = inlined_call_operand.vmem [shape: f32[4,16,8], index: 1, kind: input, shape index: {}]   ;;  %s947_s2 = inlined_call_operand.vmem [shape: f32[1,8], index: 2, kind: input, shape index: {}]   ;;  %s948_s3 = inlined_call_operand.hbm [shape: f32[2,8,8,8], index: 3, kind: output, shape index: {}]  }
   0x1   :  { %10 = vsyncpa [#allocation3 + $0x1], 0  ;;  %s739_s12 = smov 0   ;;  %s741_s13 = smov 0  }
   0x2   :  { %s743_s14 = smov 0   ;;  %s745_s15 = smov 0  }
   0x3 LB: > { %s760_s16 = sadd.s32 4294967295, %s715_s15   ;;  %s560_s17 = sadd.s32 4294967294, %s715_s15   ;;  %s715_s15 = sphi %s745_s15, %s954_s15   ;;  %s711_s14 = sphi %s743_s14, %s953_s14   ;;  %s707_s13 = sphi %s741_s13, %s952_s13   ;;  %s703_s12 = sphi %s739_s12, %s951_s12  }
   0x4   : > { %s764_s18 = sadd.s32 1, %s715_s15   ;;  %s91_s19 = sadd.s32 1, %s711_s14 }
   0x5   : > { %s88_s20 = ssub.s32 %s715_s15, %s764_s18  ;;  %p101_p0 = scmp.ne.s32.totalorder %s711_s14, %s707_s13 }
   0x6   : > { %p89_p1 = scmp.eq.s32.totalorder %s88_s20, 0  ;;  %p102_p2 = scmp.eq.s32.totalorder %s760_s16, 1 }
   0x7   : > { %p107_p3 = scmp.ne.s32.totalorder %s707_s13, %s703_s12  ;;  %p108_p4 = scmp.eq.s32.totalorder %s560_s17, 1 }
   0x8   : > { %s775_s21 = scalar_select %p89_p1, %s711_s14, %s91_s19  }
   0x9   : > { %p777_p5 = por %p102_p2, %p101_p0  ;;  %p781_p6 = por %p108_p4, %p107_p3 }
   0xa   : > { %p563_p7 = scmp.ge.s32.totalorder %s715_s15, 1  ;;  %p140_p8 = scmp.lt.s32.totalorder %s715_s15, 3 }
   0xc   : > { %p141_p9 = pnand %p563_p7, %p140_p8 }
   0xd   : > { %p164_p10 = scmp.lt.s32.totalorder (!%p141_p9), %s760_s16, 1  ;;  %s161_s27 = sand.u32 (!%p141_p9), 1, %s707_s13  }
   0xe   : > { %144 = sbr.rel (%p141_p9) target bundleno = 224 (0xe0), region = 32  ;;  %s564_s28 = sshll.u32 (!%p141_p9), %s161_s27, 6 }
   0xf   : > { %s886_s4 = scalar_lea.vmem (!%p141_p9), [#allocation2], %s564_s28  ;;  %s609_s5 = sshll.u32 (!%p141_p9), %s760_s16, 6 }
  0x10   : > { %s494_s8 = scalar_lea.hbm (!%p141_p9), %s948_s3, %s609_s5  ;;  %s673_s24 = scalar_lea.hbm (!%p141_p9), %s948_s3, 128 }
  0x11   : > { %s497_s10 = sshll.u32 (!%p141_p9), %s494_s8, 4  ;;  %s498_s10 = int_to_ptr.hbm [resolvable:$true] %s497_s10 }
  0x12   : > { %s667_s11 = sshra.s32 (!%p141_p9), %s498_s10, 4  ;;  %s668_s11 = int_to_ptr.hbm [resolvable:$true] %s667_s11 }
  0x13   : > { %v585_v0 = vld [vmem:[%s946_s1 + $0x28] sm:$0xff]  ;;  %v584_v1 = vld [vmem:[%s946_s1 + $0x20] sm:$0xff]  ;;  %v595_v2 = vld [vmem:[%s946_s1 + $0x38] sm:$0xff]  ;;  %s165_s9 = scalar_select %p164_p10, %s760_s16, 1  ;;  %vm233_vm0 = vcmask 130048   ;;  %vm205_vm1 = vcmask 1046528  }
  0x14   : > { %368 = vmatpush.msra.mxu2 %v585_v0  ;;  %426 = vmatpush.msra.mxu3 %v595_v2  ;;  %v567_v3 = vld [vmem:[%s946_s1 + $0x18] sm:$0xff]  ;;  %v188_v4 = vld [vmem:[%s946_s1 + $0x8] sm:$0xff]  ;;  %v594_v5 = vld [vmem:[%s946_s1 + $0x30] sm:$0xff]  ;;  %vm473_vm2 = vcmask 64512   ;;  %s483_s16 = scalar_lea.sflag [#allocation3], %s161_s27  ;;  %s669_s17 = scalar_lea.hbm %s668_s11, 64 }
  0x15   : > { %264 = vmatpush.msra.mxu0 %v567_v3  ;;  %321 = vmatpush.msra.mxu1 %v188_v4  ;;  %v566_v6 = vld [vmem:[%s946_s1 + $0x10] sm:$0xff]  ;;  %v187_v7 = vld [vmem:[%s946_s1] sm:$0xff]  ;;  %s610_s20 = smul.u32 144, %s165_s9  ;;  %s495_s9 = sshll.u32 %s886_s4, 4  ;;  %s496_s9 = int_to_ptr.vmem [resolvable:$true] %s495_s9 }
  0x16   : > { %369 = vmatpush.msra.mxu2 %v584_v1  ;;  %427 = vmatpush.msra.mxu3 %v594_v5  ;;  %v883_v58 = vld [vmem:[%s947_s2] ss:$0 sm:$0xff]  ;;  %p670_p11 = scmp.ne.s32.totalorder %s668_s11, %s669_s17  ;;  %p674_p0 = scmp.lt.s32.totalorder %s668_s11, %s948_s3 }
  0x17   : > { %265 = vmatpush.msra.mxu0 %v566_v6  ;;  %322 = vmatpush.msra.mxu1 %v187_v7  ;;  %s816_s26 = scalar_lea.vmem %s945_s0, %s610_s20  ;;  %p675_p1 = scmp.lt.s32.totalorder %s673_s24, %s669_s17 }
  0x18   : > { %v171_v8 = vld [vmem:[%s816_s26 + $0x10] sm:$0xff]  ;;  %v172_v9 = vld [vmem:[%s816_s26 + $0x18] sm:$0x1]  ;;  %v169_v10 = vld [vmem:[%s816_s26] sm:$0xff]  ;;  %p671_p12 = pnand %p670_p11, %p777_p5 }
  0x19   : > { %v209_v11 = vrot.slane %v171_v8, 1  ;;  %586 = vmatmul.msk.f32.vlgmr.msra.gmra.mxu2 %vm233_vm0, %v171_v8  ;;  %v210_v12 = vrot.slane %v172_v9, 1  ;;  %v170_v13 = vld [vmem:[%s816_s26 + $0x8] sm:$0x1]  ;;  %v206_v14 = vrot.slane %v169_v10, 1  ;;  %576 = vmatmul.msk.f32.vlgmr.msra.gmra.mxu1 %vm233_vm0, %v169_v10  ;;  %v173_v16 = vld [vmem:[%s816_s26 + $0x20] sm:$0xff]  ;;  %p676_p2 = por %p675_p1, %p674_p0 }
  0x1a   : > { %v207_v15 = vrot.slane %v170_v13, 1  ;;  %v174_v17 = vld [vmem:[%s816_s26 + $0x28] sm:$0x1]  ;;  %v212_v20 = vrot.slane %v173_v16, 1  ;;  %v175_v23 = vld [vmem:[%s816_s26 + $0x30] sm:$0xff]  ;;  %v177_v28 = vld [vmem:[%s816_s26 + $0x40] sm:$0xff]  ;;  %p672_p13 = pneg %p671_p12 }
  0x1b   : > { %v211_v18 = vsel %vm205_vm1, %v209_v11, %v210_v12  ;;  %v213_v21 = vrot.slane %v174_v17, 1  ;;  %v176_v24 = vld [vmem:[%s816_s26 + $0x38] sm:$0x1]  ;;  %v215_v25 = vrot.slane %v175_v23, 1  ;;  %v178_v29 = vld [vmem:[%s816_s26 + $0x48] sm:$0x1] }
  0x1c   : > { %596 = vmatmul.msk.f32.vlgmr.msra.gmra.mxu3 %vm233_vm0, %v211_v18  ;;  %v208_v19 = vsel %vm205_vm1, %v206_v14, %v207_v15  ;;  %v216_v26 = vrot.slane %v176_v24, 1  ;;  %v218_v30 = vrot.slane %v177_v28, 1  ;;  %v219_v31 = vrot.slane %v178_v29, 1  ;;  %v179_v33 = vld [vmem:[%s816_s26 + $0x50] sm:$0xff]  ;;  %v180_v34 = vld [vmem:[%s816_s26 + $0x58] sm:$0x1]  ;;  %p677_p3 = pnand %p676_p2, %p672_p13 }
  0x1d   : > { %568 = vmatmul.msk.f32.vlgmr.msra.gmra.mxu0 %vm233_vm0, %v208_v19  ;;  %v214_v22 = vsel %vm205_vm1, %v212_v20, %v213_v21  ;;  %v221_v35 = vrot.slane %v179_v33, 1  ;;  %v222_v36 = vrot.slane %v180_v34, 1  ;;  %v181_v38 = vld [vmem:[%s816_s26 + $0x60] sm:$0xff]  ;;  %v182_v39 = vld [vmem:[%s816_s26 + $0x68] sm:$0x1]  ;;  %v183_v43 = vld [vmem:[%s816_s26 + $0x70] sm:$0xff] }
  0x1e   : > { %v217_v27 = vsel %vm205_vm1, %v215_v25, %v216_v26  ;;  %v220_v32 = vsel %vm205_vm1, %v218_v30, %v219_v31  ;;  %v224_v40 = vrot.slane %v181_v38, 1  ;;  %v225_v41 = vrot.slane %v182_v39, 1  ;;  %v184_v44 = vld [vmem:[%s816_s26 + $0x78] sm:$0x1]  ;;  %v185_v48 = vld [vmem:[%s816_s26 + $0x80] sm:$0xff] }
  0x1f   : > { %v223_v37 = vsel %vm205_vm1, %v221_v35, %v222_v36  ;;  %v227_v45 = vrot.slane %v183_v43, 1  ;;  %v228_v46 = vrot.slane %v184_v44, 1  ;;  %v186_v49 = vld [vmem:[%s816_s26 + $0x88] sm:$0x1]  ;;  %v404_v50 = vrot.slane %v185_v48, 1 }
  0x20   : > { %v226_v42 = vsel %vm205_vm1, %v224_v40, %v225_v41  ;;  %v405_v51 = vrot.slane %v186_v49, 1 }
  0x21   : > { %587 = vmatmul.msk.f32.gmra.mxu2 %vm233_vm0, %v173_v16  ;;  %577 = vmatmul.msk.f32.gmra.mxu1 %vm233_vm0, %v171_v8  ;;  %v229_v47 = vsel %vm205_vm1, %v227_v45, %v228_v46 }
  0x22   : > { %v406_v52 = vsel %vm205_vm1, %v404_v50, %v405_v51 }
  0x24   : > { %597 = vmatmul.msk.f32.gmra.mxu3 %vm233_vm0, %v214_v22 }
  0x25   : > { %569 = vmatmul.msk.f32.gmra.mxu0 %vm233_vm0, %v211_v18 }
  0x29   : > { %588 = vmatmul.msk.f32.gmra.mxu2 %vm233_vm0, %v175_v23  ;;  %578 = vmatmul.msk.f32.gmra.mxu1 %vm233_vm0, %v173_v16 }
  0x2c   : > { %598 = vmatmul.msk.f32.gmra.mxu3 %vm233_vm0, %v217_v27 }
  0x2d   : > { %570 = vmatmul.msk.f32.gmra.mxu0 %vm233_vm0, %v214_v22 }
  0x31   : > { %589 = vmatmul.msk.f32.gmra.mxu2 %vm233_vm0, %v177_v28  ;;  %579 = vmatmul.msk.f32.gmra.mxu1 %vm233_vm0, %v175_v23 }
  0x34   : > { %599 = vmatmul.msk.f32.gmra.mxu3 %vm233_vm0, %v220_v32 }
  0x35   : > { %571 = vmatmul.msk.f32.gmra.mxu0 %vm233_vm0, %v217_v27 }
  0x39   : > { %590 = vmatmul.msk.f32.gmra.mxu2 %vm233_vm0, %v179_v33  ;;  %580 = vmatmul.msk.f32.gmra.mxu1 %vm233_vm0, %v177_v28 }
  0x3c   : > { %600 = vmatmul.msk.f32.gmra.mxu3 %vm233_vm0, %v223_v37 }
  0x3d   : > { %572 = vmatmul.msk.f32.gmra.mxu0 %vm233_vm0, %v220_v32 }
  0x41   : > { %591 = vmatmul.msk.f32.gmra.mxu2 %vm233_vm0, %v181_v38  ;;  %581 = vmatmul.msk.f32.gmra.mxu1 %vm233_vm0, %v179_v33 }
  0x44   : > { %601 = vmatmul.msk.f32.gmra.mxu3 %vm233_vm0, %v226_v42 }
  0x45   : > { %573 = vmatmul.msk.f32.gmra.mxu0 %vm233_vm0, %v223_v37 }
  0x49   : > { %592 = vmatmul.msk.f32.gmra.mxu2 %vm233_vm0, %v183_v43  ;;  %582 = vmatmul.msk.f32.gmra.mxu1 %vm233_vm0, %v181_v38 }
  0x4c   : > { %602 = vmatmul.msk.f32.gmra.mxu3 %vm233_vm0, %v229_v47 }
  0x4d   : > { %574 = vmatmul.msk.f32.gmra.mxu0 %vm233_vm0, %v226_v42 }
  0x51   : > { %593 = vmatmul.msk.f32.gmra.mxu2 %vm233_vm0, %v185_v48  ;;  %583 = vmatmul.msk.f32.gmra.mxu1 %vm233_vm0, %v183_v43 }
  0x54   : > { %603 = vmatmul.msk.f32.gmra.mxu3 %vm233_vm0, %v406_v52 }
  0x55   : > { %575 = vmatmul.msk.f32.gmra.mxu0 %vm233_vm0, %v229_v47 }
  0x96   : > { %v324_v53 = vpop.f32.mrf.mxu1 }
  0x9a   : > { %v267_v54 = vpop.f32.mrf.mxu0 }
  0x9b   : > { %v325_v55 = vadd.f32 %v324_v53, %v267_v54 }
  0x9c   : > { %v371_v56 = vpop.f32.mrf.mxu2 }
  0x9d   : > { %v395_v57 = vadd.f32 %v371_v56, %v325_v55 }
  0x9e   : > { %v327_v59 = vpop.f32.mrf.mxu1 }
  0x9f   : > { %v429_v60 = vpop.f32.mrf.mxu3 }
  0xa0   : > { %v453_v61 = vadd.f32 %v429_v60, %v395_v57 }
  0xa2   : > { %v465_v62 = vadd.f32 %v883_v58, %v453_v61  ;;  %v270_v63 = vpop.f32.mrf.mxu0 }
  0xa3   : > { %v328_v0 = vadd.f32 %v327_v59, %v270_v63 }
  0xa4   : > { %474 = vst.msk [vmem:[%s886_s4] sm:$0xff] %vm473_vm2, %v465_v62  ;;  %v374_v1 = vpop.f32.mrf.mxu2 }
  0xa5   : > { %v396_v2 = vadd.f32 %v374_v1, %v328_v0 }
  0xa6   : > { %v330_v3 = vpop.f32.mrf.mxu1 }
  0xa7   : > { %v432_v4 = vpop.f32.mrf.mxu3 }
  0xa8   : > { %v454_v5 = vadd.f32 %v432_v4, %v396_v2 }
  0xaa   : > { %v466_v6 = vadd.f32 %v883_v58, %v454_v5  ;;  %v273_v7 = vpop.f32.mrf.mxu0 }
  0xab   : > { %v331_v8 = vadd.f32 %v330_v3, %v273_v7 }
  0xac   : > { %475 = vst.msk [vmem:[%s886_s4 + $0x8] sm:$0xff] %vm473_vm2, %v466_v6  ;;  %v377_v9 = vpop.f32.mrf.mxu2 }
  0xad   : > { %v397_v10 = vadd.f32 %v377_v9, %v331_v8 }
  0xae   : > { %v333_v11 = vpop.f32.mrf.mxu1 }
  0xaf   : > { %v435_v12 = vpop.f32.mrf.mxu3 }
  0xb0   : > { %v455_v13 = vadd.f32 %v435_v12, %v397_v10 }
  0xb2   : > { %v467_v14 = vadd.f32 %v883_v58, %v455_v13  ;;  %v276_v15 = vpop.f32.mrf.mxu0 }
  0xb3   : > { %v334_v16 = vadd.f32 %v333_v11, %v276_v15 }
  0xb4   : > { %476 = vst.msk [vmem:[%s886_s4 + $0x10] sm:$0xff] %vm473_vm2, %v467_v14  ;;  %v380_v17 = vpop.f32.mrf.mxu2 }
  0xb5   : > { %v398_v18 = vadd.f32 %v380_v17, %v334_v16 }
  0xb6   : > { %v336_v19 = vpop.f32.mrf.mxu1 }
  0xb7   : > { %v438_v20 = vpop.f32.mrf.mxu3 }
  0xb8   : > { %v456_v21 = vadd.f32 %v438_v20, %v398_v18 }
  0xba   : > { %v468_v22 = vadd.f32 %v883_v58, %v456_v21  ;;  %v279_v23 = vpop.f32.mrf.mxu0 }
  0xbb   : > { %v337_v24 = vadd.f32 %v336_v19, %v279_v23 }
  0xbc   : > { %477 = vst.msk [vmem:[%s886_s4 + $0x18] sm:$0xff] %vm473_vm2, %v468_v22  ;;  %v383_v25 = vpop.f32.mrf.mxu2 }
  0xbd   : > { %v399_v26 = vadd.f32 %v383_v25, %v337_v24 }
  0xbe   : > { %v339_v27 = vpop.f32.mrf.mxu1 }
  0xbf   : > { %v441_v28 = vpop.f32.mrf.mxu3 }
  0xc0   : > { %v457_v29 = vadd.f32 %v441_v28, %v399_v26 }
  0xc2   : > { %v469_v30 = vadd.f32 %v883_v58, %v457_v29  ;;  %v282_v31 = vpop.f32.mrf.mxu0 }
  0xc3   : > { %v340_v32 = vadd.f32 %v339_v27, %v282_v31 }
  0xc4   : > { %478 = vst.msk [vmem:[%s886_s4 + $0x20] sm:$0xff] %vm473_vm2, %v469_v30  ;;  %v386_v33 = vpop.f32.mrf.mxu2 }
  0xc5   : > { %v400_v34 = vadd.f32 %v386_v33, %v340_v32 }
  0xc6   : > { %v342_v35 = vpop.f32.mrf.mxu1 }
  0xc7   : > { %v444_v36 = vpop.f32.mrf.mxu3 }
  0xc8   : > { %v458_v37 = vadd.f32 %v444_v36, %v400_v34 }
  0xca   : > { %v470_v38 = vadd.f32 %v883_v58, %v458_v37  ;;  %v285_v39 = vpop.f32.mrf.mxu0 }
  0xcb   : > { %v343_v40 = vadd.f32 %v342_v35, %v285_v39 }
  0xcc   : > { %479 = vst.msk [vmem:[%s886_s4 + $0x28] sm:$0xff] %vm473_vm2, %v470_v38  ;;  %v389_v41 = vpop.f32.mrf.mxu2 }
  0xcd   : > { %v401_v42 = vadd.f32 %v389_v41, %v343_v40 }
  0xce   : > { %v345_v45 = vpop.f32.mrf.mxu1 }
  0xcf   : > { %v447_v43 = vpop.f32.mrf.mxu3 }
  0xd0   : > { %v459_v44 = vadd.f32 %v447_v43, %v401_v42 }
  0xd2   : > { %v471_v46 = vadd.f32 %v883_v58, %v459_v44  ;;  %v288_v47 = vpop.f32.mrf.mxu0 }
  0xd3   : > { %v346_v48 = vadd.f32 %v345_v45, %v288_v47 }
  0xd4   : > { %480 = vst.msk [vmem:[%s886_s4 + $0x30] sm:$0xff] %vm473_vm2, %v471_v46  ;;  %v392_v49 = vpop.f32.mrf.mxu2 }
  0xd5   : > { %v402_v50 = vadd.f32 %v392_v49, %v346_v48 }
  0xd7   : > { %v450_v51 = vpop.f32.mrf.mxu3 }
  0xd8   : > { %v460_v52 = vadd.f32 %v450_v51, %v402_v50 }
  0xda   : > { %v472_v53 = vadd.f32 %v883_v58, %v460_v52 }
  0xdc   : > { %481 = vst.msk [vmem:[%s886_s4 + $0x38] sm:$0xff] %vm473_vm2, %v472_v53 }
  0xdd   : > { %680 = shalt.err (!%p677_p3)
}
  0xde   : > { %s717_s27 = smov 128   ;;  %s718_s28 = smov 8  }
  0xdf   : > { %611 = dma.vmem_to_hbm [thread:$0]  (%p777_p5), %s496_s9, 1024, %s498_s10, %s483_s16, %s717_s27, %s717_s27, %s718_s28  }
  0xe0 PF: > { %p617_p4 = scmp.ge.s32.totalorder %s715_s15, 2  ;;  %s512_s29 = sand.u32 1, %s703_s12  }
  0xe1   : > { %s513_s30 = scalar_lea.sflag [#allocation3], %s512_s29 }
  0xe2   : > { %p614_p7 = pnand %p617_p4, %p781_p6 }
  0xe4   : > { %p615_p8 = pneg %p614_p7 }
  0xe6   : > { %698 = dma.done.wait (%p615_p8), %s513_s30, 1024  }
  0xe7   : > { %700 = vsyncadd (%p615_p8), %s513_s30, 4294966272  ;;  %p13_p9 = scmp.ge.s32.totalorder %s764_s18, 4   ;;  %s951_s12 = smov %s707_s13 }
  0xe8   : > { %s952_s13 = smov %s711_s14  ;;  %s953_s14 = smov %s775_s21 }
  0xe9   : > { %s954_s15 = smov %s764_s18  ;;  %15 = sbr.rel (!%p13_p9) target bundleno = 3 (0x3), region = 70 }
  0xee   :  { %519 = vsyncpa [#allocation3], 1 }
  0xef   :  { %521 = vsyncpa [#allocation3 + $0x1], 1 }

</bundles_post_ra>
